<compile_context>
chip_gen: v7x
topology: tpu7x:2x2x1
jax: 0.10.0
libtpu: 0.0.40
codegen_flags: <defaults>
</compile_context>

<pallas_src>
import jax
import jax.numpy as jnp
from jax.experimental import pallas as pl
from jax.experimental.pallas import tpu as pltpu


def _pooler_kernel(x_ref, w_ref, b_ref, o_ref):
    # x_ref: (tm, H), w_ref: (H, H), b_ref: (1, H), o_ref: (tm, H)
    # MXU matmul with f32 accumulation regardless of input dtype (f32 or bf16).
    y = jnp.dot(x_ref[...], w_ref[...], preferred_element_type=jnp.float32)
    y = y + b_ref[...].astype(jnp.float32)   # bias + tanh in f32
    o_ref[...] = jnp.tanh(y).astype(o_ref.dtype)


def bert_pooler_pallas(hidden_states, w_t, b, *, tm=256, matmul_dtype=None):
    """hidden_states: [B, S, H]; w_t: [H, H] (= W.T); b: [H].

    tm: row tile (rows fed to the MXU per grid step). Default 256; keep it a
        multiple of 8 (f32) / 16 (bf16) — it is clamped to M for small problems.
    matmul_dtype: optional cast for x and w_t (e.g. jnp.bfloat16) — accumulation,
        bias and tanh stay in f32; output keeps hidden_states.dtype.
    """
    B, S, H = hidden_states.shape
    M = B * S
    out_dtype = hidden_states.dtype

    x = hidden_states.reshape(M, H)
    if matmul_dtype is not None:
        x = x.astype(matmul_dtype)
        w_t = w_t.astype(matmul_dtype)
    b2d = b.astype(jnp.float32).reshape(1, H)

    # Clamp the row tile to the problem size. min(tm, M) is always a legal block:
    # either it is the caller's multiple-of-8 tile, or it spans the full M dim.
    tm = min(tm, M)

    # VMEM budget: double-buffered x / out tiles + the (constant, fetched-once but
    # still double-buffered) weight + bias, with 2x headroom. Floor at v5e's 16 MiB
    # default scoped limit, cap comfortably below v7x's 64 MiB physical VMEM.
    in_itemsize = jnp.dtype(x.dtype).itemsize
    out_itemsize = jnp.dtype(out_dtype).itemsize
    vmem_bytes = (
        2 * tm * H * in_itemsize       # x tiles (double-buffered)
        + 2 * tm * H * out_itemsize    # out tiles (double-buffered)
        + 2 * H * H * in_itemsize      # weight buffers (constant index_map -> 1 DMA)
        + 2 * H * 4                    # bias
    )
    vmem_limit = int(min(max(2 * vmem_bytes, 16 * 1024 * 1024), 48 * 1024 * 1024))

    out = pl.pallas_call(
        _pooler_kernel,
        out_shape=jax.ShapeDtypeStruct((M, H), out_dtype),
        grid_spec=pl.GridSpec(
            grid=(pl.cdiv(M, tm),),
            in_specs=[
                pl.BlockSpec((tm, H), lambda i: (i, 0)),   # row tile of x
                pl.BlockSpec((H, H), lambda i: (0, 0)),    # full weight, constant block
                pl.BlockSpec((1, H), lambda i: (0, 0)),    # bias, constant block
            ],
            out_specs=pl.BlockSpec((tm, H), lambda i: (i, 0)),
        ),
        compiler_params=pltpu.CompilerParams(
            dimension_semantics=("parallel",),   # shard row tiles across TCs (v7x)
            vmem_limit_bytes=vmem_limit,
        ),
    )(x, w_t, b2d)

    return out.reshape(B, S, H)


if __name__ == "__main__":
    # Small shapes consistent with the module: batch=2, seq=8, hidden=32.
    B, S, H = 2, 8, 32
    key = jax.random.PRNGKey(0)
    k_x, k_w, k_b = jax.random.split(key, 3)

    hidden_states = jax.random.normal(k_x, (B, S, H), dtype=jnp.float32)
    # Deterministic "Linear" params: torch weight has shape (out=H, in=H); store W.T.
    W = jax.random.normal(k_w, (H, H), dtype=jnp.float32) * 0.02
    b = jax.random.normal(k_b, (H,), dtype=jnp.float32) * 0.02
    W_t = W.T

    # Reference (plain JAX), same semantics as the module: tanh(x @ W.T + b) per token.
    ref = jnp.tanh(jnp.einsum("bsh,oh->bso", hidden_states, W) + b)

    # f32 path — tight tolerance.
    out = jax.block_until_ready(bert_pooler_pallas(hidden_states, W_t, b))
    assert out.shape == (B, S, H)
    assert jnp.allclose(out, ref, atol=1e-5, rtol=1e-5)

    # bf16-input path (recommended production config on v6e/v7x): bf16 MXU inputs,
    # f32 accumulation + bias + tanh — looser tolerance from the bf16 input rounding.
    out_bf16 = jax.block_until_ready(
        bert_pooler_pallas(hidden_states, W_t, b, matmul_dtype=jnp.bfloat16)
    )
    assert out_bf16.shape == (B, S, H)
    assert jnp.allclose(out_bf16, ref, atol=2e-2, rtol=2e-2)

    print("KERNEL_OK")
</pallas_src>

<mosaic_0001>
module attributes {stable_mosaic.version = 11 : i64} {
  func.func @_pooler_kernel(%arg0: i32, %arg1: memref<16x32xf32, #tpu.memory_space<vmem>>, %arg2: memref<32x32xf32, #tpu.memory_space<vmem>>, %arg3: memref<1x32xf32, #tpu.memory_space<vmem>>, %arg4: memref<16x32xf32, #tpu.memory_space<vmem>>) attributes {dimension_semantics = [#tpu.dimension_semantics<parallel>], iteration_bounds = array<i64: 1>, scalar_prefetch = 0 : i64, scratch_operands = 0 : i64, tpu.core_type = #tpu.core_type<tc>, window_params = [{transform_indices = @transform_0, window_bounds = array<i64: 16, 32>}, {pipeline_mode = #tpu.pipeline_mode<synchronous>, transform_indices = @transform_1, window_bounds = array<i64: 32, 32>}, {pipeline_mode = #tpu.pipeline_mode<synchronous>, transform_indices = @transform_2, window_bounds = array<i64: 1, 32>}, {transform_indices = @transform_3, window_bounds = array<i64: 16, 32>}]} {
    %c0 = arith.constant 0 : index
    %c0_0 = arith.constant 0 : index
    %0 = vector.load %arg1[%c0, %c0_0] : memref<16x32xf32, #tpu.memory_space<vmem>>, vector<16x32xf32>
    %c0_1 = arith.constant 0 : index
    %c0_2 = arith.constant 0 : index
    %1 = vector.load %arg2[%c0_1, %c0_2] : memref<32x32xf32, #tpu.memory_space<vmem>>, vector<32x32xf32>
    %cst = arith.constant dense<0.000000e+00> : vector<16x32xf32>
    %2 = tpu.matmul %0, %1, %cst {dimension_numbers = #tpu.dot_dimension_numbers<[1], [0], [0], [1], [0, 0, 1, 1], [], []>} : vector<16x32xf32>, vector<32x32xf32>, vector<16x32xf32> -> vector<16x32xf32>
    %c0_3 = arith.constant 0 : index
    %c0_4 = arith.constant 0 : index
    %3 = vector.load %arg3[%c0_3, %c0_4] : memref<1x32xf32, #tpu.memory_space<vmem>>, vector<1x32xf32>
    %4 = vector.broadcast %3 : vector<1x32xf32> to vector<16x32xf32>
    %5 = arith.addf %2, %4 : vector<16x32xf32>
    %6 = math.tanh %5 : vector<16x32xf32>
    %c0_5 = arith.constant 0 : index
    %c0_6 = arith.constant 0 : index
    %7 = vector.load %arg4[%c0_5, %c0_6] : memref<16x32xf32, #tpu.memory_space<vmem>>, vector<16x32xf32>
    tpu.vector_store %arg4[%c0_5, %c0_6], %6 {strides = array<i32>} : memref<16x32xf32, #tpu.memory_space<vmem>>, vector<16x32xf32>,
    return
  }
  func.func @transform_0(%arg0: i32) -> (i32, i32) {
    %c0_i32 = arith.constant 0 : i32
    %c0_i32_0 = arith.constant 0 : i32
    return %arg0, %c0_i32 : i32, i32
  }
  func.func @transform_1(%arg0: i32) -> (i32, i32) {
    %c0_i32 = arith.constant 0 : i32
    %c0_i32_0 = arith.constant 0 : i32
    %c0_i32_1 = arith.constant 0 : i32
    return %c0_i32, %c0_i32_0 : i32, i32
  }
  func.func @transform_2(%arg0: i32) -> (i32, i32) {
    %c0_i32 = arith.constant 0 : i32
    %c0_i32_0 = arith.constant 0 : i32
    %c0_i32_1 = arith.constant 0 : i32
    return %c0_i32, %c0_i32_0 : i32, i32
  }
  func.func @transform_3(%arg0: i32) -> (i32, i32) {
    %c0_i32 = arith.constant 0 : i32
    %c0_i32_0 = arith.constant 0 : i32
    return %arg0, %c0_i32 : i32, i32
  }
}

</mosaic_0001>

<bundles_post_ra>
// kernel: tpu_custom_call.1
= control target key start
LH: loop header
LB: loop body
LE: loop exit
PB: predicated region body
PF: predicated region fallthrough
CT: control target
= control target key end

     0   :  { %8 = vsyncpa [#allocation3], 0  ;;  %s346_s0 = inlined_call_operand.hbm [shape: f32[16,32], index: 0, kind: input, shape index: {}]   ;;  %s347_s1 = inlined_call_operand.hbm [shape: f32[32,32], index: 1, kind: input, shape index: {}]   ;;  %s348_s2 = inlined_call_operand.vmem [shape: f32[1,32], index: 2, kind: input, shape index: {}]   ;;  %s349_s3 = inlined_call_operand.hbm [shape: f32[16,32], index: 3, kind: output, shape index: {}]  }
   0x1   :  { %9 = vsyncpa [#allocation6], 0 }
   0x2   :  { %10 = vsyncpa [#allocation4], 0  ;;  %s269_s12 = smov [#allocation2]   ;;  %s197_s16 = scalar_lea.hbm %s346_s0, 256 }
   0x3   :  { %s16_s13 = sshll.u32 %s269_s12, 4  ;;  %p198_p0 = scmp.ne.s32.totalorder %s346_s0, %s197_s16  ;;  %s17_s13 = int_to_ptr.vmem [resolvable:$true] %s16_s13 }
   0x4   :  { %p201_p1 = scmp.lt.u32.totalorder %s197_s16, %s346_s0 }
   0x6   :  { %p203_p2 = pnand %p201_p1, %p198_p0 }
   0x8   :  { %206 = shalt.err (!%p203_p2)
}
   0x9   :  { %s207_s21 = scalar_lea.vmem %s17_s13, 256  ;;  %p212_p4 = scmp.lt.s32.totalorder %s17_s13, %s17_s13 }
   0xa   :  { %p208_p3 = scmp.ne.s32.totalorder %s17_s13, %s207_s21  ;;  %p213_p5 = scmp.lt.s32.totalorder %s207_s21, %s207_s21 }
   0xc   :  { %p214_p6 = por %p213_p5, %p212_p4 }
   0xe   :  { %p215_p7 = pnand %p214_p6, %p208_p3 }
  0x10   :  { %218 = shalt.err (!%p215_p7)
}
  0x11   :  { %s270_s22 = smov 128   ;;  %s271_s23 = smov 8  }
  0x12   :  { %22 = dma.hbm_to_vmem [thread:$0]  %s346_s0, 256, %s17_s13, [#allocation3], %s270_s22, %s270_s22, %s271_s23  }
  0x13   :  { %s272_s26 = smov [#allocation5]   ;;  %s219_s30 = scalar_lea.hbm %s347_s1, 512 }
  0x14   :  { %s28_s27 = sshll.u32 %s272_s26, 4  ;;  %p220_p8 = scmp.ne.s32.totalorder %s347_s1, %s219_s30  ;;  %s29_s27 = int_to_ptr.vmem [resolvable:$true] %s28_s27 }
  0x15   :  { %p223_p9 = scmp.lt.u32.totalorder %s219_s30, %s347_s1 }
  0x17   :  { %p225_p10 = pnand %p223_p9, %p220_p8 }
  0x19   :  { %228 = shalt.err (!%p225_p10)
}
  0x1a   :  { %s229_s8 = scalar_lea.vmem %s29_s27, 512  ;;  %p234_p12 = scmp.lt.s32.totalorder %s29_s27, %s29_s27 }
  0x1b   :  { %p230_p11 = scmp.ne.s32.totalorder %s29_s27, %s229_s8  ;;  %p235_p13 = scmp.lt.s32.totalorder %s229_s8, %s229_s8 }
  0x1d   :  { %p236_p0 = por %p235_p13, %p234_p12 }
  0x1f   :  { %p237_p1 = pnand %p236_p0, %p230_p11 }
  0x21   :  { %240 = shalt.err (!%p237_p1)
}
  0x22   :  { %34 = dma.hbm_to_vmem [thread:$0]  %s347_s1, 512, %s29_s27, [#allocation6], %s270_s22, %s270_s22, %s271_s23  }
  0x23   :  { %263 = dma.done.wait [#allocation3], 256  }
  0x24   :  { %264 = vsyncadd [#allocation3], 4294967040 }
  0x25   :  { %265 = dma.done.wait [#allocation6], 512  }
  0x26   :  { %266 = vsyncadd [#allocation6], 4294966784  ;;  %vm56_vm0 = vcmask 261120   ;;  %v45_v0 = vld [vmem:[#allocation5] sm:$0xff]  ;;  %v46_v1 = vld [vmem:[#allocation5 + $0x8] sm:$0xff]  ;;  %s273_s11 = smov [#allocation7]  }
  0x27   :  { %v47_v2 = vld [vmem:[#allocation5 + $0x10] sm:$0xff]  ;;  %v180_v3 = vpack.c.bf16 %v46_v1, %v45_v0  ;;  %v48_v4 = vld [vmem:[#allocation5 + $0x18] sm:$0xff]  ;;  %s147_s12 = sshll.u32 %s273_s11, 4  ;;  %s148_s12 = int_to_ptr.vmem [resolvable:$true] %s147_s12 }
  0x28   :  { %v43_v5 = vld [vmem:[#allocation2] sm:$0xff]  ;;  %v184_v6 = vpack.c.bf16 %v48_v4, %v47_v2  ;;  %v44_v7 = vld [vmem:[#allocation2 + $0x8] sm:$0xff]  ;;  %s241_s13 = scalar_lea.vmem %s148_s12, 256  ;;  %p246_p3 = scmp.lt.s32.totalorder %s148_s12, %s148_s12 }
  0x29   :  { %177 = vmatprep.mubr.msk.f32.mxu0 %vm56_vm0, %v43_v5  ;;  %181 = vmatprep.subr.bf16.mxu0 %v180_v3  ;;  %v160_v8 = vld [vmem:[%s348_s2] ss:$0 sm:$0xff]  ;;  %p242_p2 = scmp.ne.s32.totalorder %s148_s12, %s241_s13  ;;  %p247_p4 = scmp.lt.s32.totalorder %s241_s13, %s241_s13 }
  0x2a   :  { %183 = vmatpush3.bf16.msra.mxu0 %v180_v3 }
  0x2b   :  { %185 = vmatprep.subr.bf16.mxu0 %v184_v6  ;;  %p248_p5 = por %p247_p4, %p246_p3 }
  0x2d   :  { %p249_p6 = pnand %p248_p5, %p242_p2 }
  0x2e   :  { %187 = vmatpush3.bf16.msra.mxu0 %v184_v6 }
  0x31   :  { %178 = vmatmul.mubr.msk.f32.vlgmr.msra.gmra.mrb[0].mxu0 %vm56_vm0, %v44_v7 }
 0x104   :  { %v179_v9 = vpop.f32.mrb[0].mxu0 }
 0x105   :  { %v135_v10 = vadd.f32 %v179_v9, %v160_v8  ;;  %v129_v11 = vpop.f32.mrb[1].mxu0 }
 0x106   :  { %v130_v12 = vadd.f32 %v160_v8, %v129_v11 }
 0x107   :  { %193 = vtanh.f32 %v135_v10 }
 0x108   :  { %195 = vtanh.f32 %v130_v12 }
 0x111   :  { %v194_v13 = vpop.eup %193 }
 0x112   :  { %v196_v14 = vpop.eup %195  ;;  %141 = vst.msk [vmem:[#allocation7 + $0x8] sm:$0xff] %vm56_vm0, %v194_v13 }
 0x113   :  { %140 = vst.msk [vmem:[#allocation7] sm:$0xff] %vm56_vm0, %v196_v14 }
 0x114   :  { %252 = shalt.err (!%p249_p6)
}
 0x115   :  { %s253_s15 = scalar_lea.hbm %s349_s3, 256 }
 0x116   :  { %p254_p7 = scmp.ne.s32.totalorder %s349_s3, %s253_s15  ;;  %p257_p8 = scmp.lt.u32.totalorder %s253_s15, %s349_s3 }
 0x118   :  { %p259_p9 = pnand %p257_p8, %p254_p7 }
 0x11a   :  { %262 = shalt.err (!%p259_p9)
}
 0x11b   :  { %153 = dma.vmem_to_hbm [thread:$0]  %s148_s12, 256, %s349_s3, [#allocation4], %s270_s22, %s270_s22, %s271_s23  }
 0x11c   :  { %267 = dma.done.wait [#allocation4], 256  }
 0x11d   :  { %268 = vsyncadd [#allocation4], 4294967040 }
 0x11e   :  { %157 = vsyncpa [#allocation3], 1 }
 0x11f   :  { %158 = vsyncpa [#allocation6], 1 }
 0x120   :  { %159 = vsyncpa [#allocation4], 1 }

</bundles_post_ra>
